<compile_context>
chip_gen: v6e
topology: v6e:2x2x1
jax: 0.10.0
libtpu: 0.0.40
codegen_flags: <defaults>
</compile_context>

<pallas_src>
import functools

import jax
import jax.numpy as jnp
from jax.experimental import pallas as pl
from jax.experimental.pallas import tpu as pltpu


def _round_up(a, b):
    return ((a + b - 1) // b) * b


def _pad_cols(a, cols):
    pad = cols - a.shape[-1]
    if pad == 0:
        return a
    return jnp.concatenate([a, jnp.zeros(a.shape[:-1] + (pad,), a.dtype)], axis=-1)


def _latent_encoder_kernel(
    x_ref,       # (tm, in_dim)
    w0_ref,      # (in_dim, dim)        fc_0 weight
    ws_ref,      # (in_dim, dim)        shortcut weight
    b01_ref,     # (2, dim)             row 0 = b0, row 1 = b1  (f32)
    w1_ref,      # (dim, dim)           fc_1 weight (zero-init in the module)
    whead_ref,   # (dim, head_cols)     [wmu | wlv] zero-padded to lane-dense width
    bhead_ref,   # (1, head_cols)       [bmu | blv] zero-padded            (f32)
    *out_refs,   # 1 ref (tm, head_cols)  OR  2 refs (tm, od_pad) each
):
    f32 = jnp.float32
    x = x_ref[...]
    h = jnp.maximum(x, 0)                                         # relu(x)

    b01 = b01_ref[...].astype(f32)
    net = jnp.dot(h, w0_ref[...], preferred_element_type=f32) + b01[0:1, :]
    x_s = jnp.dot(x, ws_ref[...], preferred_element_type=f32)

    dx = jnp.dot(jnp.maximum(net, 0.0).astype(w1_ref.dtype), w1_ref[...],
                 preferred_element_type=f32) + b01[1:2, :]

    x_out = x_s + dx
    # final_nl=True -> leaky_relu(negative_slope=0.2)
    x_out = jnp.where(x_out > 0.0, x_out, 0.2 * x_out)

    # Fused heads: one matmul, lane-dense store(s).
    out = jnp.dot(x_out.astype(whead_ref.dtype), whead_ref[...],
                  preferred_element_type=f32) + bhead_ref[...].astype(f32)

    if len(out_refs) == 1:
        out_refs[0][...] = out.astype(out_refs[0].dtype)
    else:
        mu_ref, lv_ref = out_refs
        c = mu_ref.shape[-1]                   # multiple of 128 -> clean slices
        mu_ref[...] = out[:, :c].astype(mu_ref.dtype)
        lv_ref[...] = out[:, c:].astype(lv_ref.dtype)


def pack_params(params, *, operand_dtype=jnp.float32):
    """Pack / pad weights ONCE at parameter-load time (not per forward call)."""
    out_dim = params["wmu"].shape[1]
    if 2 * out_dim <= 128:
        # Combined [mu | logvar] head padded to one lane-dense 128-wide slab.
        w_head = _pad_cols(jnp.concatenate([params["wmu"], params["wlv"]], axis=1), 128)
        b_head = _pad_cols(jnp.concatenate([params["bmu"], params["blv"]], axis=1), 128)
    else:
        # Each head padded to a 128 multiple; kernel writes two output refs.
        od_pad = _round_up(out_dim, 128)
        w_head = jnp.concatenate([_pad_cols(params["wmu"], od_pad),
                                  _pad_cols(params["wlv"], od_pad)], axis=1)
        b_head = jnp.concatenate([_pad_cols(params["bmu"], od_pad),
                                  _pad_cols(params["blv"], od_pad)], axis=1)
    return dict(
        w0=params["w0"].astype(operand_dtype),
        ws=params["ws"].astype(operand_dtype),
        w1=params["w1"].astype(operand_dtype),
        b01=jnp.concatenate([params["b0"], params["b1"]], axis=0),   # (2, dim), f32
        w_head=w_head.astype(operand_dtype),
        b_head=b_head,                                               # f32
    )


def latent_encoder_forward(x, packed, *, out_dim, tm=1024, out_dtype=jnp.float32):
    """x: (..., in_dim). Returns (mu, logvar), each (..., out_dim)."""
    w0, ws, w1 = packed["w0"], packed["ws"], packed["w1"]
    b01, w_head, b_head = packed["b01"], packed["w_head"], packed["b_head"]
    in_dim, dim = w0.shape
    head_cols = w_head.shape[1]
    split_heads = 2 * out_dim > 128
    operand_dtype = w0.dtype

    lead = x.shape[:-1]
    x2 = x.reshape(-1, in_dim).astype(operand_dtype)
    M = x2.shape[0]

    # Row tile: large, but at least 2 grid steps when M allows (v7x megacore).
    # bf16 rows pack two per sublane -> multiple of 16.
    row_mult = 8 if jnp.dtype(operand_dtype).itemsize >= 4 else 16
    tm_eff = max(row_mult, min(int(tm), _round_up(pl.cdiv(M, 2), row_mult)))

    # Explicit VMEM budget (everything counted as double-buffered, conservatively).
    item = jnp.dtype(operand_dtype).itemsize
    out_item = jnp.dtype(out_dtype).itemsize
    w_bytes = (w0.size + ws.size + w1.size + w_head.size) * item
    b_bytes = (b01.size + b_head.size) * 4

    def footprint(rows):
        return 2 * (rows * in_dim * item + rows * head_cols * out_item
                    + w_bytes + b_bytes)

    while tm_eff > row_mult and footprint(tm_eff) > (48 << 20):   # v7x-safe budget
        tm_eff = max(row_mult, _round_up(tm_eff // 2, row_mult))
    vmem_limit = int(min(max(footprint(tm_eff) + (4 << 20), 16 << 20), 64 << 20))

    grid = (pl.cdiv(M, tm_eff),)   # no host-side pad; ragged edge block is clipped

    flops = 2 * M * (2 * in_dim * dim + dim * dim + dim * head_cols)
    bytes_accessed = int(M * in_dim * item + M * head_cols * out_item
                         + w_bytes + b_bytes)
    cost = pl.CostEstimate(flops=flops, transcendentals=0,
                           bytes_accessed=bytes_accessed)

    full = lambda shape: pl.BlockSpec(shape, lambda i: (0,) * len(shape))

    if split_heads:
        od_pad = head_cols // 2
        out_shape = (jax.ShapeDtypeStruct((M, od_pad), out_dtype),
                     jax.ShapeDtypeStruct((M, od_pad), out_dtype))
        out_specs = (pl.BlockSpec((tm_eff, od_pad), lambda i: (i, 0)),
                     pl.BlockSpec((tm_eff, od_pad), lambda i: (i, 0)))
    else:
        out_shape = jax.ShapeDtypeStruct((M, head_cols), out_dtype)
        out_specs = pl.BlockSpec((tm_eff, head_cols), lambda i: (i, 0))

    # TODO(synk): add pipeline_mode=pl.Buffered(3) on the x spec if an xprof
    # trace shows exposed DMA at very small feature dims.
    result = pl.pallas_call(
        _latent_encoder_kernel,
        out_shape=out_shape,
        grid_spec=pltpu.PrefetchScalarGridSpec(
            num_scalar_prefetch=0,
            grid=grid,
            in_specs=[
                pl.BlockSpec((tm_eff, in_dim), lambda i: (i, 0)),
                full((in_dim, dim)),
                full((in_dim, dim)),
                full((2, dim)),
                full((dim, dim)),
                full((dim, head_cols)),
                full((1, head_cols)),
            ],
            out_specs=out_specs,
        ),
        compiler_params=pltpu.CompilerParams(
            dimension_semantics=("parallel",),      # row axis shards across v7x TCs
            vmem_limit_bytes=vmem_limit),
        cost_estimate=cost,
    )(x2, w0, ws, b01, w1, w_head, b_head)

    if split_heads:
        mu_full, lv_full = result
        mu = mu_full[:, :out_dim].reshape(*lead, out_dim)
        lv = lv_full[:, :out_dim].reshape(*lead, out_dim)
    else:
        out2 = result
        mu = out2[:, :out_dim].reshape(*lead, out_dim)
        lv = out2[:, out_dim:2 * out_dim].reshape(*lead, out_dim)
    return mu, lv


def init_params(key, in_dim, dim, out_dim):
    """Deterministic init mirroring nn.Linear defaults; fc_1.weight is zero
    (as in ResnetBlockFC.__init__)."""
    def linear(key, fan_in, fan_out, bias=True):
        kw, kb = jax.random.split(key)
        bound = 1.0 / jnp.sqrt(fan_in)
        w = jax.random.uniform(kw, (fan_in, fan_out), jnp.float32, -bound, bound)
        b = (jax.random.uniform(kb, (1, fan_out), jnp.float32, -bound, bound)
             if bias else None)
        return w, b

    k0, k1, ks, kmu, klv = jax.random.split(key, 5)
    w0, b0 = linear(k0, in_dim, dim)
    _, b1 = linear(k1, dim, dim)
    w1 = jnp.zeros((dim, dim), jnp.float32)        # nn.init.zeros_(fc_1.weight)
    ws, _ = linear(ks, in_dim, dim, bias=False)    # shortcut (in_dim != dim)
    wmu, bmu = linear(kmu, dim, out_dim)
    wlv, blv = linear(klv, dim, out_dim)
    return dict(w0=w0, b0=b0, w1=w1, b1=b1, ws=ws,
                wmu=wmu, bmu=bmu, wlv=wlv, blv=blv)


def reference_forward(x, p):
    """Pure-JAX reference matching the PyTorch module."""
    h = jnp.maximum(x, 0.0)
    net = h @ p["w0"] + p["b0"]
    dx = jnp.maximum(net, 0.0) @ p["w1"] + p["b1"]
    x_s = x @ p["ws"]
    xo = x_s + dx
    xo = jnp.where(xo > 0.0, xo, 0.2 * xo)
    return xo @ p["wmu"] + p["bmu"], xo @ p["wlv"] + p["blv"]


if __name__ == "__main__":
    key = jax.random.PRNGKey(0)
    kx, kp = jax.random.split(key)

    B, N = 2, 8
    in_dim, dim, out_dim = 16, 32, 8

    x = jax.random.normal(kx, (B, N, in_dim), jnp.float32)
    params = init_params(kp, in_dim, dim, out_dim)
    packed = pack_params(params)                    # once, at parameter-load time

    fwd = jax.jit(functools.partial(latent_encoder_forward, out_dim=out_dim))
    mu, logvar = fwd(x, packed)
    jax.block_until_ready((mu, logvar))

    mu_ref, lv_ref = reference_forward(x.reshape(-1, in_dim), params)
    mu_ref = mu_ref.reshape(B, N, out_dim)
    lv_ref = lv_ref.reshape(B, N, out_dim)

    assert mu.shape == (B, N, out_dim) and logvar.shape == (B, N, out_dim)
    assert jnp.allclose(mu, mu_ref, atol=1e-5, rtol=1e-5)
    assert jnp.allclose(logvar, lv_ref, atol=1e-5, rtol=1e-5)

    print("KERNEL_OK")
</pallas_src>

<mosaic_0001>
module attributes {stable_mosaic.version = 11 : i64} {
  func.func @_latent_encoder_kernel(%arg0: i32, %arg1: memref<8x16xf32, #tpu.memory_space<vmem>>, %arg2: memref<16x32xf32, #tpu.memory_space<vmem>>, %arg3: memref<16x32xf32, #tpu.memory_space<vmem>>, %arg4: memref<2x32xf32, #tpu.memory_space<vmem>>, %arg5: memref<32x32xf32, #tpu.memory_space<vmem>>, %arg6: memref<32x128xf32, #tpu.memory_space<vmem>>, %arg7: memref<1x128xf32, #tpu.memory_space<vmem>>, %arg8: memref<8x128xf32, #tpu.memory_space<vmem>>) attributes {dimension_semantics = [#tpu.dimension_semantics<parallel>], iteration_bounds = array<i64: 2>, scalar_prefetch = 0 : i64, scratch_operands = 0 : i64, tpu.core_type = #tpu.core_type<tc>, window_params = [{transform_indices = @transform_0, window_bounds = array<i64: 8, 16>}, {pipeline_mode = #tpu.pipeline_mode<synchronous>, transform_indices = @transform_1, window_bounds = array<i64: 16, 32>}, {pipeline_mode = #tpu.pipeline_mode<synchronous>, transform_indices = @transform_2, window_bounds = array<i64: 16, 32>}, {pipeline_mode = #tpu.pipeline_mode<synchronous>, transform_indices = @transform_3, window_bounds = array<i64: 2, 32>}, {pipeline_mode = #tpu.pipeline_mode<synchronous>, transform_indices = @transform_4, window_bounds = array<i64: 32, 32>}, {pipeline_mode = #tpu.pipeline_mode<synchronous>, transform_indices = @transform_5, window_bounds = array<i64: 32, 128>}, {pipeline_mode = #tpu.pipeline_mode<synchronous>, transform_indices = @transform_6, window_bounds = array<i64: 1, 128>}, {transform_indices = @transform_7, window_bounds = array<i64: 8, 128>}]} {
    %c0 = arith.constant 0 : index
    %c0_0 = arith.constant 0 : index
    %0 = vector.load %arg1[%c0, %c0_0] : memref<8x16xf32, #tpu.memory_space<vmem>>, vector<8x16xf32>
    %cst = arith.constant 0.000000e+00 : f32
    %1 = vector.broadcast %cst : f32 to vector<8x16xf32>
    %2 = arith.maximumf %0, %1 : vector<8x16xf32>
    %c0_1 = arith.constant 0 : index
    %c0_2 = arith.constant 0 : index
    %3 = vector.load %arg4[%c0_1, %c0_2] : memref<2x32xf32, #tpu.memory_space<vmem>>, vector<2x32xf32>
    %c0_3 = arith.constant 0 : index
    %c0_4 = arith.constant 0 : index
    %4 = vector.load %arg2[%c0_3, %c0_4] : memref<16x32xf32, #tpu.memory_space<vmem>>, vector<16x32xf32>
    %cst_5 = arith.constant dense<0.000000e+00> : vector<8x32xf32>
    %5 = tpu.matmul %2, %4, %cst_5 {dimension_numbers = #tpu.dot_dimension_numbers<[1], [0], [0], [1], [0, 0, 1, 1], [], []>} : vector<8x16xf32>, vector<16x32xf32>, vector<8x32xf32> -> vector<8x32xf32>
    %6 = vector.extract_strided_slice %3 {offsets = [0, 0], sizes = [1, 32], strides = [1, 1]} : vector<2x32xf32> to vector<1x32xf32>
    %7 = vector.broadcast %6 : vector<1x32xf32> to vector<8x32xf32>
    %8 = arith.addf %5, %7 : vector<8x32xf32>
    %c0_6 = arith.constant 0 : index
    %c0_7 = arith.constant 0 : index
    %9 = vector.load %arg3[%c0_6, %c0_7] : memref<16x32xf32, #tpu.memory_space<vmem>>, vector<16x32xf32>
    %cst_8 = arith.constant dense<0.000000e+00> : vector<8x32xf32>
    %10 = tpu.matmul %0, %9, %cst_8 {dimension_numbers = #tpu.dot_dimension_numbers<[1], [0], [0], [1], [0, 0, 1, 1], [], []>} : vector<8x16xf32>, vector<16x32xf32>, vector<8x32xf32> -> vector<8x32xf32>
    %cst_9 = arith.constant 0.000000e+00 : f32
    %11 = vector.broadcast %cst_9 : f32 to vector<8x32xf32>
    %12 = arith.maximumf %8, %11 : vector<8x32xf32>
    %c0_10 = arith.constant 0 : index
    %c0_11 = arith.constant 0 : index
    %13 = vector.load %arg5[%c0_10, %c0_11] : memref<32x32xf32, #tpu.memory_space<vmem>>, vector<32x32xf32>
    %cst_12 = arith.constant dense<0.000000e+00> : vector<8x32xf32>
    %14 = tpu.matmul %12, %13, %cst_12 {dimension_numbers = #tpu.dot_dimension_numbers<[1], [0], [0], [1], [0, 0, 1, 1], [], []>} : vector<8x32xf32>, vector<32x32xf32>, vector<8x32xf32> -> vector<8x32xf32>
    %15 = vector.extract_strided_slice %3 {offsets = [1, 0], sizes = [1, 32], strides = [1, 1]} : vector<2x32xf32> to vector<1x32xf32>
    %16 = vector.broadcast %15 : vector<1x32xf32> to vector<8x32xf32>
    %17 = arith.addf %14, %16 : vector<8x32xf32>
    %18 = arith.addf %10, %17 : vector<8x32xf32>
    %cst_13 = arith.constant 0.000000e+00 : f32
    %19 = vector.broadcast %cst_13 : f32 to vector<8x32xf32>
    %20 = arith.cmpf ogt, %18, %19 : vector<8x32xf32>
    %cst_14 = arith.constant 2.000000e-01 : f32
    %21 = vector.broadcast %cst_14 : f32 to vector<8x32xf32>
    %22 = arith.mulf %21, %18 : vector<8x32xf32>
    %23 = arith.select %20, %18, %22 : vector<8x32xi1>, vector<8x32xf32>
    %c0_15 = arith.constant 0 : index
    %c0_16 = arith.constant 0 : index
    %24 = vector.load %arg6[%c0_15, %c0_16] : memref<32x128xf32, #tpu.memory_space<vmem>>, vector<32x128xf32>
    %cst_17 = arith.constant dense<0.000000e+00> : vector<8x128xf32>
    %25 = tpu.matmul %23, %24, %cst_17 {dimension_numbers = #tpu.dot_dimension_numbers<[1], [0], [0], [1], [0, 0, 1, 1], [], []>} : vector<8x32xf32>, vector<32x128xf32>, vector<8x128xf32> -> vector<8x128xf32>
    %c0_18 = arith.constant 0 : index
    %c0_19 = arith.constant 0 : index
    %26 = vector.load %arg7[%c0_18, %c0_19] : memref<1x128xf32, #tpu.memory_space<vmem>>, vector<1x128xf32>
    %27 = vector.broadcast %26 : vector<1x128xf32> to vector<8x128xf32>
    %28 = arith.addf %25, %27 : vector<8x128xf32>
    %c0_20 = arith.constant 0 : index
    %c0_21 = arith.constant 0 : index
    %29 = vector.load %arg8[%c0_20, %c0_21] : memref<8x128xf32, #tpu.memory_space<vmem>>, vector<8x128xf32>
    tpu.vector_store %arg8[%c0_20, %c0_21], %28 {strides = array<i32>} : memref<8x128xf32, #tpu.memory_space<vmem>>, vector<8x128xf32>,
    return
  }
  func.func @transform_0(%arg0: i32) -> (i32, i32) {
    %c0_i32 = arith.constant 0 : i32
    %c0_i32_0 = arith.constant 0 : i32
    return %arg0, %c0_i32 : i32, i32
  }
  func.func @transform_1(%arg0: i32) -> (i32, i32) {
    %c0_i32 = arith.constant 0 : i32
    %c0_i32_0 = arith.constant 0 : i32
    %c0_i32_1 = arith.constant 0 : i32
    return %c0_i32, %c0_i32_0 : i32, i32
  }
  func.func @transform_2(%arg0: i32) -> (i32, i32) {
    %c0_i32 = arith.constant 0 : i32
    %c0_i32_0 = arith.constant 0 : i32
    %c0_i32_1 = arith.constant 0 : i32
    return %c0_i32, %c0_i32_0 : i32, i32
  }
  func.func @transform_3(%arg0: i32) -> (i32, i32) {
    %c0_i32 = arith.constant 0 : i32
    %c0_i32_0 = arith.constant 0 : i32
    %c0_i32_1 = arith.constant 0 : i32
    return %c0_i32, %c0_i32_0 : i32, i32
  }
  func.func @transform_4(%arg0: i32) -> (i32, i32) {
    %c0_i32 = arith.constant 0 : i32
    %c0_i32_0 = arith.constant 0 : i32
    %c0_i32_1 = arith.constant 0 : i32
    return %c0_i32, %c0_i32_0 : i32, i32
  }
  func.func @transform_5(%arg0: i32) -> (i32, i32) {
    %c0_i32 = arith.constant 0 : i32
    %c0_i32_0 = arith.constant 0 : i32
    %c0_i32_1 = arith.constant 0 : i32
    return %c0_i32, %c0_i32_0 : i32, i32
  }
  func.func @transform_6(%arg0: i32) -> (i32, i32) {
    %c0_i32 = arith.constant 0 : i32
    %c0_i32_0 = arith.constant 0 : i32
    %c0_i32_1 = arith.constant 0 : i32
    return %c0_i32, %c0_i32_0 : i32, i32
  }
  func.func @transform_7(%arg0: i32) -> (i32, i32) {
    %c0_i32 = arith.constant 0 : i32
    %c0_i32_0 = arith.constant 0 : i32
    return %arg0, %c0_i32 : i32, i32
  }
}

</mosaic_0001>

<bundles_post_ra>
// kernel: latent_encoder_forward.1
= control target key start
LH: loop header
LB: loop body
LE: loop exit
PB: predicated region body
PF: predicated region fallthrough
CT: control target
= control target key end

     0   :  { %12 = vsyncpa [#allocation3], 0  ;;  %s1359_s0 = inlined_call_operand.hbm [shape: f32[16,16], index: 0, kind: input, shape index: {}]   ;;  %s1360_s1 = inlined_call_operand.hbm [shape: f32[16,32], index: 1, kind: input, shape index: {}]   ;;  %s1361_s2 = inlined_call_operand.hbm [shape: f32[16,32], index: 2, kind: input, shape index: {}]   ;;  %s1362_s3 = inlined_call_operand.vmem [shape: f32[2,32], index: 3, kind: input, shape index: {}]   ;;  %s1363_s4 = inlined_call_operand.hbm [shape: f32[32,32], index: 4, kind: input, shape index: {}]   ;;  %s1364_s5 = inlined_call_operand.hbm [shape: f32[32,128], index: 5, kind: input, shape index: {}]   ;;  %s1365_s6 = inlined_call_operand.vmem [shape: f32[1,128], index: 6, kind: input, shape index: {}]   ;;  %s1366_s7 = inlined_call_operand.vmem [shape: f32[16,128], index: 7, kind: output, shape index: {}]  }
   0x1   :  { %14 = vsyncpa [#allocation3 + $0x1], 0 }
   0x2   :  { %15 = vsyncpa [#allocation5], 0 }
   0x3   :  { %16 = vsyncpa [#allocation8], 0  ;;  %s1168_s24 = smov 0   ;;  %s1170_s25 = smov 0  }
   0x4   :  { %s1172_s26 = smov 0   ;;  %s1174_s27 = smov 0  }
   0x5 LB: > { %s1119_s28 = smov [#allocation4]   ;;  %s1189_s30 = sadd.s32 4294967295, %s1117_s27   ;;  %s1117_s27 = sphi %s1174_s27, %s1383_s27   ;;  %s1113_s26 = sphi %s1172_s26, %s1382_s26   ;;  %s1109_s25 = sphi %s1170_s25, %s1381_s25   ;;  %s1105_s24 = sphi %s1168_s24, %s1380_s24  }
   0x6   : > { %s217_s29 = sshll.u32 %s1119_s28, 4  ;;  %p785_p0 = scmp.ge.s32.totalorder %s1117_s27, 1  ;;  %s218_s29 = int_to_ptr.vmem [resolvable:$true] %s217_s29 }
   0x7   : > { %p1367_p1 = scmp.eq.s32.totalorder %s1189_s30, 0  ;;  %p205_p2 = scmp.lt.s32.totalorder %s1117_s27, 3 }
   0x8   : > { %s1120_s9 = smov [#allocation7]   ;;  %s1121_s12 = smov [#allocation6]  }
   0x9   : > { %p1194_p3 = pnand %p785_p0, %p205_p2  ;;  %s246_s10 = sshll.u32 %s1120_s9, 4  ;;  %s1206_s10 = int_to_ptr.vmem [resolvable:$true] %s246_s10 }
   0xa   : > { %s230_s13 = sshll.u32 %s1121_s12, 4  ;;  %s954_s14 = scalar_lea.vmem %s218_s29, 256  ;;  %s1208_s13 = int_to_ptr.vmem [resolvable:$true] %s230_s13 }
   0xb   : > { %s1370_s8 = scalar_select %p1194_p3, 1, 0 }
   0xc   : > { %p877_p4 = pneg %p1194_p3  ;;  %p955_p7 = scmp.ne.s32.totalorder %s218_s29, %s954_s14 }
   0xd   : > { %p962_p10 = scmp.lt.s32.totalorder %s218_s29, %s218_s29  ;;  %p963_p11 = scmp.lt.s32.totalorder %s954_s14, %s954_s14 }
   0xe   : > { %p1202_p5 = pnand %p877_p4, %p1367_p1 }
   0xf   : > { %p964_p12 = por %p963_p11, %p962_p10 }
  0x10   : > { %p945_p6 = pneg %p1202_p5 }
  0x12   : > { %p957_p8 = pnand %p955_p7, %p945_p6 }
  0x14   : > { %p958_p9 = pneg %p957_p8 }
  0x16   : > { %p965_p13 = pnand %p964_p12, %p958_p9 }
  0x18   : > { %968 = shalt.err (!%p965_p13)
}
  0x19   : > { %s1122_s15 = smov 128   ;;  %s1123_s16 = smov 8  }
  0x1a   : > { %880 = dma.hbm_to_vmem [thread:$0]  (!%p1202_p5), %s1360_s1, 256, %s218_s29, [#allocation5], %s1122_s15, %s1122_s15, %s1123_s16  }
  0x1b   : > { %s980_s19 = scalar_lea.vmem %s1206_s10, 512  ;;  %p988_p7 = scmp.lt.s32.totalorder %s1206_s10, %s1206_s10 }
  0x1c   : > { %p981_p0 = scmp.ne.s32.totalorder %s1206_s10, %s980_s19  ;;  %p989_p8 = scmp.lt.s32.totalorder %s980_s19, %s980_s19 }
  0x1e   : > { %p983_p2 = pnand %p981_p0, %p945_p6  ;;  %p990_p9 = por %p989_p8, %p988_p7 }
  0x20   : > { %p984_p4 = pneg %p983_p2 }
  0x22   : > { %p991_p10 = pnand %p990_p9, %p984_p4 }
  0x24   : > { %994 = shalt.err (!%p991_p10)
}
  0x25   : > { %886 = dma.hbm_to_vmem [thread:$0]  (!%p1202_p5), %s1363_s4, 512, %s1206_s10, [#allocation8], %s1122_s15, %s1122_s15, %s1123_s16  }
  0x26   : > { %s1006_s22 = scalar_lea.vmem %s1208_s13, 256  ;;  %p1014_p0 = scmp.lt.s32.totalorder %s1208_s13, %s1208_s13 }
  0x27   : > { %p1007_p11 = scmp.ne.s32.totalorder %s1208_s13, %s1006_s22  ;;  %p1015_p2 = scmp.lt.s32.totalorder %s1006_s22, %s1006_s22 }
  0x29   : > { %p1009_p12 = pnand %p1007_p11, %p945_p6  ;;  %p1016_p4 = por %p1015_p2, %p1014_p0 }
  0x2b   : > { %p1010_p13 = pneg %p1009_p12 }
  0x2d   : > { %p1017_p7 = pnand %p1016_p4, %p1010_p13 }
  0x2f   : > { %1020 = shalt.err (!%p1017_p7)
}
  0x30   : > { %883 = dma.hbm_to_vmem [thread:$0]  (!%p1202_p5), %s1361_s2, 256, %s1208_s13, [#allocation5], %s1122_s15, %s1122_s15, %s1123_s16  }
  0x31   : > { %s1124_s29 = smov [#allocation9]  }
  0x32   : > { %s259_s9 = sshll.u32 %s1124_s29, 4  ;;  %s260_s9 = int_to_ptr.vmem [resolvable:$true] %s259_s9 }
  0x33   : > { %s1032_s10 = scalar_lea.vmem %s260_s9, 512  ;;  %p1040_p11 = scmp.lt.s32.totalorder %s260_s9, %s260_s9 }
  0x34   : > { %p1033_p8 = scmp.ne.s32.totalorder %s260_s9, %s1032_s10  ;;  %p1041_p12 = scmp.lt.s32.totalorder %s1032_s10, %s1032_s10 }
  0x36   : > { %p1035_p9 = pnand %p1033_p8, %p945_p6  ;;  %p1042_p13 = por %p1041_p12, %p1040_p11 }
  0x38   : > { %p1036_p10 = pneg %p1035_p9 }
  0x3a   : > { %p1043_p0 = pnand %p1042_p13, %p1036_p10 }
  0x3c   : > { %1046 = shalt.err (!%p1043_p0)
}
  0x3d   : > { %889 = dma.hbm_to_vmem [thread:$0]  (!%p1202_p5), %s1364_s5, 512, %s260_s9, [#allocation8], %s1122_s15, %s1122_s15, %s1123_s16  }
  0x3e   : > { %s1267_s11 = sadd.s32 1, %s1117_s27   ;;  %s29_s14 = sadd.s32 1, %s1113_s26 }
  0x3f   : > { %s26_s17 = ssub.s32 %s1117_s27, %s1267_s11  ;;  %p36_p6 = scmp.ne.s32.totalorder %s1113_s26, %s1109_s25 }
  0x40   : > { %p27_p2 = scmp.eq.s32.totalorder %s26_s17, 0  ;;  %p37_p4 = scmp.eq.s32.totalorder %s1117_s27, 0 }
  0x41   : > { %p42_p7 = scmp.ne.s32.totalorder %s1109_s25, %s1105_s24  ;;  %p898_p8 = scmp.lt.s32.totalorder %s1117_s27, 2 }
  0x42   : > { %s1279_s18 = scalar_select %p27_p2, %s1113_s26, %s29_s14  }
  0x43   : > { %p38_p9 = por %p37_p4, %p36_p6  ;;  %p1283_p10 = por %p1367_p1, %p42_p7 }
  0x44   : > { %s276_s20 = sand.u32 1, %s1113_s26   ;;  %s792_s15 = sshll.u32 %s1117_s27, 7 }
  0x45   : > { %s1372_s19 = scalar_select %p1283_p10, 1, 0 }
  0x46   : > { %s791_s16 = sshll.u32 %s276_s20, 3  ;;  %s1292_s23 = scalar_lea.hbm %s1359_s0, %s792_s15 }
  0x47   : > { %s280_s24 = scalar_lea.vmem [#allocation2], %s791_s16  ;;  %p1294_p5 = pnand %p898_p8, %p38_p9 }
  0x48   : > { %s287_s28 = sshll.u32 %s280_s24, 4  ;;  %s277_s9 = scalar_lea.sflag [#allocation3], %s276_s20  ;;  %s288_s28 = int_to_ptr.vmem [resolvable:$true] %s287_s28 }
  0x49   : > { %s1047_s10 = scalar_lea.hbm %s1292_s23, 128  ;;  %p1049_p12 = pneg %p1294_p5 }
  0x4a   : > { %p1048_p11 = scmp.ne.s32.totalorder %s1292_s23, %s1047_s10  ;;  %s1052_s13 = scalar_lea.hbm %s1359_s0, 256 }
  0x4b   : > { %p1053_p6 = scmp.lt.s32.totalorder %s1292_s23, %s1359_s0  ;;  %p1054_p2 = scmp.lt.s32.totalorder %s1052_s13, %s1047_s10 }
  0x4c   : > { %p1050_p13 = pnand %p1049_p12, %p1048_p11 }
  0x4d   : > { %p1055_p4 = por %p1054_p2, %p1053_p6 }
  0x4e   : > { %p1051_p0 = pneg %p1050_p13 }
  0x50   : > { %p1056_p7 = pnand %p1055_p4, %p1051_p0 }
  0x52   : > { %1059 = shalt.err (!%p1056_p7)
}
  0x53   : > { %s1060_s15 = scalar_lea.vmem %s288_s28, 128  ;;  %s1125_s20 = smov [#allocation2]  }
  0x54   : > { %p1061_p8 = scmp.ne.s32.totalorder %s288_s28, %s1060_s15  ;;  %s1065_s16 = sshll.u32 %s1125_s20, 4  ;;  %s1066_s16 = int_to_ptr.vmem [resolvable:$false] %s1065_s16 }
  0x55   : > { %s1067_s21 = scalar_lea.vmem %s1066_s16, 256  ;;  %p1068_p11 = scmp.lt.s32.totalorder %s288_s28, %s1066_s16 }
  0x56   : > { %p1063_p9 = pnand %p1061_p8, %p1049_p12  ;;  %p1069_p13 = scmp.lt.s32.totalorder %s1067_s21, %s1060_s15 }
  0x58   : > { %p1064_p1 = pneg %p1063_p9  ;;  %p1070_p10 = por %p1069_p13, %p1068_p11 }
  0x5a   : > { %p1071_p3 = pnand %p1070_p10, %p1064_p1 }
  0x5c   : > { %1074 = shalt.err (!%p1071_p3)
}
  0x5d   : > { %893 = dma.hbm_to_vmem [thread:$0]  (!%p1294_p5), %s1292_s23, 128, %s288_s28, %s277_s9  }
  0x5e   : > { %p1374_p0 = scmp.ne.s32.totalorder %s1370_s8, 0 }
  0x5f   : > { %s298_s22 = sand.u32 (!%p1374_p0), 1, %s1109_s25   ;;  %p1375_p12 = scmp.ne.s32.totalorder (!%p1374_p0), %s1372_s19, 0 }
  0x60   : > { %296 = sbr.rel (%p1374_p0) target bundleno = 707 (0x2c3), region = 48  ;;  %s794_s24 = sshll.u32 (!%p1374_p0), %s298_s22, 3 }
  0x61   : > { %s299_s10 = scalar_lea.sflag (!%p1374_p0), [#allocation3], %s298_s22  ;;  %s302_s27 = scalar_lea.vmem (!%p1374_p0), [#allocation2], %s794_s24 }
  0x65   : > { %1092 = dma.done.wait (%p1375_p12), %s299_s10, 128  }
  0x66   : > { %1094 = vsyncadd (%p1375_p12), %s299_s10, 4294967168  ;;  %p1376_p1 = scmp.eq.s32.totalorder %s1189_s30, 0 }
  0x68   : > { %1096 = dma.done.wait (%p1376_p1), [#allocation5], 512   ;;  %p1377_p3 = pmov %p1376_p1 }
  0x69   : > { %p1378_p10 = pmov %p1376_p1 }
  0x6a   : > { %1098 = vsyncadd (%p1377_p3), [#allocation5], 4294966784 }
  0x6b   : > { %1100 = dma.done.wait (%p1378_p10), [#allocation8], 1024   ;;  %p1379_p5 = pmov %p1376_p1 }
  0x6c   : > { %v1126_v0 = vmov 0.0   ;;  %vm1127_vm0 = vmmov 0   ;;  %v356_v1 = vld [vmem:[#allocation4 + $0x8] sm:$0xff]  ;;  %v355_v2 = vld [vmem:[#allocation4] sm:$0xff]  ;;  %v352_v3 = vld [vmem:[%s302_s27] sm:$0xff]  ;;  %vm361_vm1 = vcmask 130048   ;;  %v357_v11 = vlaneseq }
  0x6d   : > { %1102 = vsyncadd (%p1379_p5), [#allocation8], 4294966272  ;;  %823 = vmatprep.subr.mxu1 %v1126_v0  ;;  %827 = vmatprep.mubr.msk.f32.mxu1 %vm1127_vm0, %v1126_v0  ;;  %v353_v4 = vmax.f32 %v352_v3, 0.0  ;;  %v441_v5 = vld [vmem:[#allocation7 + $0x18] sm:$0xff]  ;;  %v440_v6 = vld [vmem:[#allocation7 + $0x10] sm:$0xff]  ;;  %vm446_vm2 = vcmask 261120  }
  0x6e   : > { %841 = vmatprep.subr.mxu0 %v1126_v0  ;;  %845 = vmatprep.mubr.msk.f32.mxu0 %vm1127_vm0, %v1126_v0  ;;  %v439_v7 = vld [vmem:[#allocation7 + $0x8] sm:$0xff]  ;;  %v436_v8 = vld [vmem:[#allocation6 + $0x8] sm:$0xff]  ;;  %v438_v9 = vld [vmem:[#allocation7] sm:$0xff]  ;;  %v358_v12 = vshrl.u32 %v357_v11, 7  ;;  %p348_p6 = scmp.lt.s32.totalorder %s1189_s30, 1 }
  0x6f   : > { %824 = vmatpush3.msra.mxu1 %v356_v1  ;;  %842 = vmatpush3.msra.mxu0 %v436_v8  ;;  %v435_v10 = vld [vmem:[#allocation6] sm:$0xff]  ;;  %v599_v21 = vld [vmem:[#allocation9 + $0x18] sm:$0xff]  ;;  %v597_v24 = vld [vmem:[#allocation9 + $0x8] sm:$0xff] }
  0x70   : > { %825 = vmatprep.subr.mxu1 %v1126_v0  ;;  %843 = vmatprep.subr.mxu0 %v1126_v0  ;;  %v359_v13 = vsub.s32 0, %v358_v12  ;;  %v354_v14 = vld [vmem:[%s1362_s3] sm:$0x3]  ;;  %v596_v25 = vld [vmem:[#allocation9] sm:$0xff]  ;;  %v444_v26 = vsub.s32 1, %v358_v12  ;;  %s1385_s30 = smov (!%p348_p6, %s1189_s30), 1 }
  0x71   : > { %826 = vmatpush3.msra.mxu1 %v355_v2  ;;  %844 = vmatpush3.msra.mxu0 %v435_v10  ;;  %v598_v23 = vld [vmem:[#allocation9 + $0x10] sm:$0xff]  ;;  %s799_s23 = sshll.u32 %s1385_s30, 3 }
  0x72   : > { %828 = vmatmul.mubr.msk.f32.vlgmr.msra.gmra.mxu1 %vm361_vm1, %v353_v4  ;;  %830 = vmatprep.subr.mxu1 %v1126_v0  ;;  %v360_v15 = vrot.slane %v354_v14, %v359_v13  ;;  %v445_v27 = vrot.slane %v354_v14, %v444_v26  ;;  %v803_v34 = vld [vmem:[%s1365_s6] ss:$0 sm:$0xff]  ;;  %s351_s13 = scalar_lea.vmem %s1366_s7, %s799_s23 }
  0x73   : > { %831 = vmatpush3.msra.mxu1 %v441_v5  ;;  %838 = vmatprep.mubr.msk.f32.mxu1 %vm1127_vm0, %v1126_v0 }
  0x74   : > { %832 = vmatprep.subr.mxu1 %v1126_v0  ;;  %846 = vmatmul.mubr.msk.f32.vlgmr.msra.gmra.mxu0 %vm361_vm1, %v352_v3 }
  0x75   : > { %833 = vmatpush3.msra.mxu1 %v440_v6  ;;  %848 = vmatprep.subr.mxu0 %v1126_v0 }
  0x76   : > { %834 = vmatprep.subr.mxu1 %v1126_v0  ;;  %856 = vmatprep.mubr.msk.f32.mxu0 %vm1127_vm0, %v1126_v0 }
  0x77   : > { %835 = vmatpush3.msra.mxu1 %v439_v7  ;;  %849 = vmatpush3.msra.mxu0 %v599_v21 }
  0x78   : > { %836 = vmatprep.subr.mxu1 %v1126_v0  ;;  %850 = vmatprep.subr.mxu0 %v1126_v0 }
  0x79   : > { %837 = vmatpush3.msra.mxu1 %v438_v9  ;;  %851 = vmatpush3.msra.mxu0 %v598_v23 }
  0x7a   : > { %852 = vmatprep.subr.mxu0 %v1126_v0 }
  0x7b   : > { %853 = vmatpush3.msra.mxu0 %v597_v24 }
  0x7c   : > { %854 = vmatprep.subr.mxu0 %v1126_v0 }
  0x7d   : > { %855 = vmatpush3.msra.mxu0 %v596_v25 }
 0x132   : > { %v431_v16 = vpop.f32.mrf.mxu1 }
 0x133   : > { %v432_v17 = vadd.f32 %v431_v16, %v360_v15 }
 0x134   : > { %v829_v18 = vpop.f32.mrf.mxu1  ;;  %v589_v20 = vpop.f32.mrf.mxu0 }
 0x135   : > { %v437_v19 = vmax.f32 %v432_v17, 0.0 }
 0x136   : > { %v847_v22 = vpop.f32.mrf.mxu0 }
 0x137   : > { %839 = vmatmul.mubr.msk.f32.vlgmr.msra.gmra.mxu1 %vm446_vm2, %v437_v19 }
 0x1f7   : > { %v516_v28 = vpop.f32.mrf.mxu1 }
 0x1f8   : > { %v517_v29 = vadd.f32 %v516_v28, %v445_v27 }
 0x1f9   : > { %v840_v30 = vpop.f32.mrf.mxu1 }
 0x1fa   : > { %v590_v31 = vadd.f32 %v589_v20, %v517_v29 }
 0x1fc   : > { %vm593_vm3 = vcmp.gt.f32.partialorder %v590_v31, 0.0  ;;  %v594_v32 = vmul.f32 0.2, %v590_v31 }
 0x1fe   : > { %v595_v33 = vsel %vm593_vm3, %v590_v31, %v594_v32 }
 0x1ff   : > { %857 = vmatmul.mubr.msk.f32.vlgmr.msra.gmra.mxu0 %vm446_vm2, %v595_v33 }
 0x2bf   : > { %v676_v35 = vpop.f32.mrf.mxu0 }
 0x2c0   : > { %v677_v36 = vadd.f32 %v803_v34, %v676_v35 }
 0x2c1   : > { %v858_v37 = vpop.f32.mrf.mxu0 }
 0x2c2   : > { %680 = vst [vmem:[%s351_s13] sm:$0xff] %v677_v36 }
 0x2c3 PF: > { %p19_p2 = scmp.ge.s32.totalorder %s1267_s11, 4   ;;  %s1380_s24 = smov %s1109_s25 }
 0x2c4   : > { %s1381_s25 = smov %s1113_s26  ;;  %s1382_s26 = smov %s1279_s18 }
 0x2c5   : > { %s1383_s27 = smov %s1267_s11  ;;  %21 = sbr.rel (!%p19_p2) target bundleno = 5 (0x5), region = 104 }
 0x2ca   :  { %700 = vsyncpa [#allocation3], 1 }
 0x2cb   :  { %702 = vsyncpa [#allocation3 + $0x1], 1 }
 0x2cc   :  { %703 = vsyncpa [#allocation5], 1 }
 0x2cd   :  { %704 = vsyncpa [#allocation8], 1 }

</bundles_post_ra>
